<compile_context>
chip_gen: v7x
topology: tpu7x:2x2x1
jax: 0.10.0
libtpu: 0.0.40
codegen_flags: <defaults>
</compile_context>

<pallas_src>
import functools

import jax
import jax.numpy as jnp
import numpy as np
from jax.experimental import pallas as pl
from jax.experimental.pallas import tpu as pltpu


def _sqex_kernel(x_ref, w1t_ref, w2t_ref, o_ref, *, inv_s):
    # x_ref block: (TN, C, S) — TN batch elements, full channel & spatial extent.
    x = x_ref[...]                                                # (TN, C, S)

    # Global average pool over the spatial (lane) axis: one-pass reduction.
    pooled = jnp.sum(x, axis=-1) * inv_s                          # (TN, C)

    # linear1 (no bias) + ReLU — single matmul, M = TN.
    y1 = jnp.maximum(
        jnp.dot(pooled, w1t_ref[...], preferred_element_type=jnp.float32), 0.0
    )                                                             # (TN, C_r)

    # linear2 (no bias) + Sigmoid — single matmul, M = TN.
    gate = jax.nn.sigmoid(
        jnp.dot(y1, w2t_ref[...], preferred_element_type=jnp.float32)
    )                                                             # (TN, C)

    # Channel-wise gating, broadcast over the spatial axis; lane-dense store.
    o_ref[...] = (x * gate[:, :, None]).astype(o_ref.dtype)


def _pick_tn(n, c, s, dtype_bytes=4, vmem_budget=8 << 20):
    """Largest batch tile TN dividing N whose double-buffered in+out blocks fit
    comfortably inside a conservative VMEM budget (safe on v7x's 64 MiB too)."""
    per_n = c * s * dtype_bytes * 4          # x block + out block, double-buffered
    tn = max(1, min(n, vmem_budget // max(per_n, 1)))
    while n % tn != 0:
        tn -= 1
    return tn


def sqex_forward(x, w1, w2):
    """x: (N, C, D, H, W) f32; w1: (C_r, C) [linear1.weight]; w2: (C, C_r)
    [linear2.weight].  Returns (N, C, D, H, W)."""
    N, C, D, H, W = x.shape
    C_r = w1.shape[0]
    S = D * H * W

    # Glue / parameter layout prep (plain JAX): transpose weights once so the
    # kernel does plain (TN, K) @ (K, M) matmuls.
    x_flat = x.reshape(N, C, S)
    w1t = jnp.asarray(w1).T                   # (C, C_r)
    w2t = jnp.asarray(w2).T                   # (C_r, C)

    TN = _pick_tn(N, C, S)

    out = pl.pallas_call(
        functools.partial(_sqex_kernel, inv_s=1.0 / float(S)),
        out_shape=jax.ShapeDtypeStruct((N, C, S), x.dtype),
        grid_spec=pltpu.PrefetchScalarGridSpec(
            num_scalar_prefetch=0,
            grid=(N // TN,),
            in_specs=[
                pl.BlockSpec((TN, C, S), lambda n: (n, 0, 0)),
                pl.BlockSpec((C, C_r), lambda n: (0, 0)),
                pl.BlockSpec((C_r, C), lambda n: (0, 0)),
            ],
            out_specs=pl.BlockSpec((TN, C, S), lambda n: (n, 0, 0)),
        ),
        compiler_params=pltpu.CompilerParams(
            dimension_semantics=("parallel",),
        ),
    )(x_flat, w1t, w2t)
    return out.reshape(N, C, D, H, W)


def _reference(x, w1, w2):
    # Pure-JAX reference mirroring the PyTorch forward.
    pooled = x.mean(axis=(2, 3, 4))                         # avg_pool3d over full extent
    y1 = jnp.maximum(pooled @ w1.T, 0.0)                    # linear1 + ReLU
    gate = jax.nn.sigmoid(y1 @ w2.T)                        # linear2 + Sigmoid
    return x * gate[:, :, None, None, None]


if __name__ == "__main__":
    # Small shapes consistent with the module: n_features=12, reduction=6 ->
    # hidden 2; batch=2; spatial 8^3 (S = 512, lane-dense).
    N, C, D, H, W = 2, 12, 8, 8, 8
    reduction = 6
    C_r = C // reduction

    key = jax.random.PRNGKey(0)
    kx, kw1, kw2 = jax.random.split(key, 3)

    x = jax.random.normal(kx, (N, C, D, H, W), dtype=jnp.float32)
    # Deterministic synthetic weights (kaiming-style scale, no checkpoint load).
    w1 = jax.random.normal(kw1, (C_r, C), dtype=jnp.float32) * np.sqrt(2.0 / C)
    w2 = jax.random.normal(kw2, (C, C_r), dtype=jnp.float32) * np.sqrt(2.0 / C_r)

    out = sqex_forward(x, w1, w2)
    out = jax.block_until_ready(out)

    ref = _reference(x, w1, w2)
    np.testing.assert_allclose(np.asarray(out), np.asarray(ref), rtol=1e-4, atol=1e-4)

    print("KERNEL_OK")
</pallas_src>

<mosaic_0001>
module attributes {stable_mosaic.version = 11 : i64} {
  func.func @_sqex_kernel(%arg0: i32, %arg1: memref<2x12x512xf32, #tpu.memory_space<vmem>>, %arg2: memref<12x2xf32, #tpu.memory_space<vmem>>, %arg3: memref<2x12xf32, #tpu.memory_space<vmem>>, %arg4: memref<2x12x512xf32, #tpu.memory_space<vmem>>) attributes {dimension_semantics = [#tpu.dimension_semantics<parallel>], iteration_bounds = array<i64: 1>, scalar_prefetch = 0 : i64, scratch_operands = 0 : i64, tpu.core_type = #tpu.core_type<tc>, window_params = [{transform_indices = @transform_0, window_bounds = array<i64: 2, 12, 512>}, {pipeline_mode = #tpu.pipeline_mode<synchronous>, transform_indices = @transform_1, window_bounds = array<i64: 12, 2>}, {pipeline_mode = #tpu.pipeline_mode<synchronous>, transform_indices = @transform_2, window_bounds = array<i64: 2, 12>}, {transform_indices = @transform_3, window_bounds = array<i64: 2, 12, 512>}]} {
    %c0 = arith.constant 0 : index
    %c0_0 = arith.constant 0 : index
    %c0_1 = arith.constant 0 : index
    %0 = vector.load %arg1[%c0, %c0_0, %c0_1] : memref<2x12x512xf32, #tpu.memory_space<vmem>>, vector<2x12x512xf32>
    %cst = arith.constant dense<0.000000e+00> : vector<2x12xf32>
    %1 = vector.multi_reduction <add>, %0, %cst [2] : vector<2x12x512xf32> to vector<2x12xf32>
    %cst_2 = arith.constant 0.001953125 : f32
    %2 = vector.broadcast %cst_2 : f32 to vector<2x12xf32>
    %3 = arith.mulf %1, %2 : vector<2x12xf32>
    %c0_3 = arith.constant 0 : index
    %c0_4 = arith.constant 0 : index
    %4 = vector.load %arg2[%c0_3, %c0_4] : memref<12x2xf32, #tpu.memory_space<vmem>>, vector<12x2xf32>
    %cst_5 = arith.constant dense<0.000000e+00> : vector<2x2xf32>
    %5 = tpu.matmul %3, %4, %cst_5 {dimension_numbers = #tpu.dot_dimension_numbers<[1], [0], [0], [1], [0, 0, 1, 1], [], []>} : vector<2x12xf32>, vector<12x2xf32>, vector<2x2xf32> -> vector<2x2xf32>
    %cst_6 = arith.constant 0.000000e+00 : f32
    %6 = vector.broadcast %cst_6 : f32 to vector<2x2xf32>
    %7 = arith.maximumf %5, %6 : vector<2x2xf32>
    %c0_7 = arith.constant 0 : index
    %c0_8 = arith.constant 0 : index
    %8 = vector.load %arg3[%c0_7, %c0_8] : memref<2x12xf32, #tpu.memory_space<vmem>>, vector<2x12xf32>
    %cst_9 = arith.constant dense<0.000000e+00> : vector<2x12xf32>
    %9 = tpu.matmul %7, %8, %cst_9 {dimension_numbers = #tpu.dot_dimension_numbers<[1], [0], [0], [1], [0, 0, 1, 1], [], []>} : vector<2x2xf32>, vector<2x12xf32>, vector<2x12xf32> -> vector<2x12xf32>
    %10 = arith.negf %9 : vector<2x12xf32>
    %11 = math.exp %10 : vector<2x12xf32>
    %cst_10 = arith.constant 1.000000e+00 : f32
    %12 = vector.broadcast %cst_10 : f32 to vector<2x12xf32>
    %13 = arith.addf %12, %11 : vector<2x12xf32>
    %14 = arith.divf %12, %13 : vector<2x12xf32>
    %15 = vector.shape_cast %14 : vector<2x12xf32> to vector<2x12x1xf32>
    %16 = vector.broadcast %15 : vector<2x12x1xf32> to vector<2x12x512xf32>
    %17 = arith.mulf %0, %16 : vector<2x12x512xf32>
    %c0_11 = arith.constant 0 : index
    %c0_12 = arith.constant 0 : index
    %c0_13 = arith.constant 0 : index
    %18 = vector.load %arg4[%c0_11, %c0_12, %c0_13] : memref<2x12x512xf32, #tpu.memory_space<vmem>>, vector<2x12x512xf32>
    tpu.vector_store %arg4[%c0_11, %c0_12, %c0_13], %17 {strides = array<i32>} : memref<2x12x512xf32, #tpu.memory_space<vmem>>, vector<2x12x512xf32>,
    return
  }
  func.func @transform_0(%arg0: i32) -> (i32, i32, i32) {
    %c0_i32 = arith.constant 0 : i32
    %c0_i32_0 = arith.constant 0 : i32
    %c0_i32_1 = arith.constant 0 : i32
    return %arg0, %c0_i32, %c0_i32_0 : i32, i32, i32
  }
  func.func @transform_1(%arg0: i32) -> (i32, i32) {
    %c0_i32 = arith.constant 0 : i32
    %c0_i32_0 = arith.constant 0 : i32
    %c0_i32_1 = arith.constant 0 : i32
    return %c0_i32, %c0_i32_0 : i32, i32
  }
  func.func @transform_2(%arg0: i32) -> (i32, i32) {
    %c0_i32 = arith.constant 0 : i32
    %c0_i32_0 = arith.constant 0 : i32
    %c0_i32_1 = arith.constant 0 : i32
    return %c0_i32, %c0_i32_0 : i32, i32
  }
  func.func @transform_3(%arg0: i32) -> (i32, i32, i32) {
    %c0_i32 = arith.constant 0 : i32
    %c0_i32_0 = arith.constant 0 : i32
    %c0_i32_1 = arith.constant 0 : i32
    return %arg0, %c0_i32, %c0_i32_0 : i32, i32, i32
  }
}

</mosaic_0001>

<bundles_post_ra>
// kernel: tpu_custom_call.1
= control target key start
LH: loop header
LB: loop body
LE: loop exit
PB: predicated region body
PF: predicated region fallthrough
CT: control target
= control target key end

     0   :  { %vm35_vm0 = vcmask 1043456   ;;  %v347_v39 = vmov 0.0|0.0   ;;  %vm348_vm1 = vmmov 1   ;;  %vm349_vm3 = vmmov 0   ;;  %s549_s0 = inlined_call_operand.vmem [shape: f32[2,12,512], index: 0, kind: input, shape index: {}]   ;;  %s550_s1 = inlined_call_operand.vmem [shape: f32[12,2], index: 1, kind: input, shape index: {}]   ;;  %s551_s2 = inlined_call_operand.vmem [shape: f32[2,12], index: 2, kind: input, shape index: {}]   ;;  %s552_s3 = inlined_call_operand.vmem [shape: f32[2,12,512], index: 3, kind: output, shape index: {}]  }
   0x1   :  { %v374_v0 = vld [vmem:[%s549_s0 + $0x40] sm:$0xff]  ;;  %v379_v1 = vld [vmem:[%s549_s0 + $0x48] sm:$0xff]  ;;  %v384_v2 = vld [vmem:[%s549_s0 + $0x50] sm:$0xff]  ;;  %335 = vmatprep.subr.bf16.mxu0 %v347_v39  ;;  %v350_v40 = vmov 0.0   ;;  %v69_v41 = vlaneseq  ;;  %vm80_vm4 = vcmask 130112   ;;  %vm91_vm5 = vcmask 1041409  }
   0x2   :  { %v389_v3 = vld [vmem:[%s549_s0 + $0x58] sm:$0xff]  ;;  %v45_v4 = vadd.f32 %v379_v1, %v374_v0  ;;  %v396_v5 = vld [vmem:[%s549_s0] sm:$0xff]  ;;  %v401_v6 = vld [vmem:[%s549_s0 + $0x8] sm:$0xff]  ;;  %327 = vmatprep.mubr.msk.f32.mxu0 %vm349_vm3, %v350_v40  ;;  %330 = vmatprep.subr.mxu1 %v350_v40  ;;  %vm93_vm6 = vcmask 97280   ;;  %vm175_vm7 = vcmask 1041408   ;;  %vm171_vm8 = vcmask 15360  }
   0x3   :  { %v406_v7 = vld [vmem:[%s549_s0 + $0x10] sm:$0xff]  ;;  %v411_v8 = vld [vmem:[%s549_s0 + $0x18] sm:$0xff]  ;;  %v30_v9 = vadd.f32 %v401_v6, %v396_v5  ;;  %v418_v10 = vld [vmem:[%s549_s0 + $0x60] sm:$0xf]  ;;  %332 = vmatprep.mubr.msk.f32.mxu1 %vm349_vm3, %v350_v40  ;;  %v70_v42 = vand.u32 127, %v69_v41  ;;  %v72_v43 = vshrl.u32 %v69_v41, 7 }
   0x4   :  { %v46_v11 = vadd.f32 %v45_v4, %v384_v2  ;;  %v424_v12 = vld [vmem:[%s549_s0 + $0x68] sm:$0xf]  ;;  %v429_v13 = vld [vmem:[%s549_s0 + $0x70] sm:$0xf]  ;;  %v434_v14 = vld [vmem:[%s549_s0 + $0x78] sm:$0xf] }
   0x5   :  { %v31_v15 = vadd.f32 %v30_v9, %v406_v7  ;;  %v50_v16 = vsel %vm35_vm0, %v418_v10, 0.0  ;;  %v51_v17 = vsel %vm35_vm0, %v424_v12, 0.0  ;;  %v53_v18 = vsel %vm35_vm0, %v429_v13, 0.0  ;;  %v446_v19 = vld [vmem:[%s549_s0 + $0x20] sm:$0xf]  ;;  %vm337_vm2 = vmpackc.low %vm35_vm0, %vm348_vm1 }
   0x6   :  { %v47_v20 = vadd.f32 %v46_v11, %v389_v3  ;;  %v52_v21 = vadd.f32 %v51_v17, %v50_v16  ;;  %v452_v22 = vld [vmem:[%s549_s0 + $0x28] sm:$0xf]  ;;  %v457_v23 = vld [vmem:[%s549_s0 + $0x30] sm:$0xf]  ;;  %v36_v24 = vsel %vm35_vm0, %v446_v19, 0.0  ;;  %v55_v26 = vsel %vm35_vm0, %v434_v14, 0.0 }
   0x7   :  { %v32_v25 = vadd.f32 %v31_v15, %v411_v8  ;;  %v467_v27 = vld [vmem:[%s549_s0 + $0x38] sm:$0xf]  ;;  %v37_v28 = vsel %vm35_vm0, %v452_v22, 0.0  ;;  %v39_v29 = vsel %vm35_vm0, %v457_v23, 0.0  ;;  %v63_v36 = vld [vmem:[%s550_s1] sm:$0xff]  ;;  %v75_v44 = vadd.s32 4294967288, %v70_v42 }
   0x8   :  { %48 = vadd.xlane.f32.xlu1 %v47_v20  ;;  %v54_v30 = vadd.f32 %v53_v18, %v52_v21  ;;  %v38_v31 = vadd.f32 %v37_v28, %v36_v24  ;;  %v41_v32 = vsel %vm35_vm0, %v467_v27, 0.0  ;;  %v64_v37 = vld [vmem:[%s550_s1 + $0x8] sm:$0xf]  ;;  %v73_v47 = vsub.s32 %v70_v42, %v72_v43  ;;  %v170_v62 = vld [vmem:[%s551_s2] sm:$0x3] }
   0x9   :  { %33 = vadd.xlane.f32.xlu0 %v32_v25  ;;  %v336_v38 = vpack.c.bf16 %v64_v37, %v63_v36  ;;  %v78_v49 = vsub.s32 %v75_v44, %v72_v43  ;;  %331 = vmatpush3.msk.msra.mxu1 %vm175_vm7, %v170_v62  ;;  %v257_v20 = vsub.s32 0, %v72_v43  ;;  %v268_v25 = vsub.s32 1, %v72_v43 }
   0xa   :  { %v56_v33 = vadd.f32 %v55_v26, %v54_v30  ;;  %v40_v34 = vadd.f32 %v39_v29, %v38_v31 }
   0xb   :  { %338 = vmatpush3.bf16.msk.msra.mxu0 %vm337_vm2, %v336_v38 }
   0xc   :  { %57 = vadd.xlane.f32.xlu1 %v56_v33  ;;  %v42_v35 = vadd.f32 %v41_v32, %v40_v34 }
   0xe   :  { %43 = vadd.xlane.f32.xlu0 %v42_v35 }
  0x95   :  { %v49_v45 = vpop.xlane.xlu1 %48 }
  0x96   :  { %v34_v46 = vpop.xlane.xlu0 %33  ;;  %v61_v48 = vmul.f32 0.001953125, %v49_v45 }
  0x97   :  { %v59_v51 = vmul.f32 0.001953125, %v34_v46 }
  0x98   :  { %v85_v54 = vrot.slane %v61_v48, %v73_v47 }
  0x99   :  { %v58_v50 = vpop.xlane.xlu1 %57  ;;  %v74_v57 = vrot.slane %v59_v51, %v73_v47 }
  0x9a   :  { %v62_v52 = vmul.f32 0.001953125, %v58_v50 }
  0x9b   :  { %v44_v53 = vpop.xlane.xlu0 %43 }
  0x9c   :  { %v89_v55 = vrot.slane %v62_v52, %v78_v49  ;;  %v60_v56 = vmul.f32 0.001953125, %v44_v53 }
  0x9e   :  { %v79_v58 = vrot.slane %v60_v56, %v78_v49  ;;  %v90_v59 = vsel %vm80_vm4, %v89_v55, %v85_v54 }
  0xa0   :  { %v81_v60 = vsel %vm80_vm4, %v79_v58, %v74_v57 }
  0xa1   :  { %v92_v61 = vsel %vm91_vm5, %v90_v59, %v81_v60 }
  0xa2   :  { %328 = vmatmul.mubr.msk.f32.vlgmr.msra.gmra.mrb[0].mxu0 %vm93_vm6, %v92_v61 }
 0x175   :  { %v165_v63 = vpop.f32.mrb[0].mxu0 }
 0x176   :  { %v169_v4 = vmax.f32 %v165_v63, 0.0  ;;  %v329_v9 = vpop.f32.mrb[1].mxu0 }
 0x178   :  { %333 = vmatmul.mubr.msk.f32.vlgmr.msra.gmra.mrb[0].mxu1 %vm171_vm8, %v169_v4 }
 0x24b   :  { %v245_v11 = vpop.f32.mrb[0].mxu1 }
 0x24c   :  { %v317_v15 = vmul.f32 -1.442695, %v245_v11  ;;  %v334_v16 = vpop.f32.mrb[1].mxu1 }
 0x24e   :  { %343 = vpow2.f32 %v317_v15 }
 0x258   :  { %v344_v17 = vpop.eup %343 }
 0x259   :  { %v252_v18 = vadd.f32 1.0, %v344_v17 }
 0x25b   :  { %345 = vrcp.f32 %v252_v18 }
 0x265   :  { %v346_v21 = vpop.eup %345 }
 0x266   :  { %v258_v24 = vrot.slane %v346_v21, %v257_v20  ;;  %v269_v26 = vrot.slane %v346_v21, %v268_v25 }
 0x268   :  { %264 = vbcast.lane.b32.xlu1 %v258_v24, 264  ;;  %260 = vbcast.lane.b32.xlu0 %v258_v24, 256 }
 0x26c   :  { %271 = vbcast.lane.b32.xlu1 %v269_v26, 256 }
 0x270   :  { %275 = vbcast.lane.b32.xlu1 %v269_v26, 264 }
 0x2da   :  { %v265_v28 = vpop.permute.xlu1 %264  ;;  %v261_v29 = vpop.permute.xlu0 %260 }
 0x2db   :  { %v281_v30 = vmul.f32 %v265_v28, %v446_v19  ;;  %v282_v31 = vmul.f32 %v265_v28, %v452_v22  ;;  %v283_v32 = vmul.f32 %v265_v28, %v457_v23  ;;  %v284_v33 = vmul.f32 %v265_v28, %v467_v27 }
 0x2dc   :  { %v277_v34 = vmul.f32 %v261_v29, %v396_v5  ;;  %v278_v35 = vmul.f32 %v261_v29, %v401_v6  ;;  %v279_v36 = vmul.f32 %v261_v29, %v406_v7  ;;  %v280_v37 = vmul.f32 %v261_v29, %v411_v8 }
 0x2dd   :  { %297 = vst [vmem:[%s552_s3 + $0x20] sm:$0xf] %v281_v30  ;;  %298 = vst [vmem:[%s552_s3 + $0x28] sm:$0xf] %v282_v31 }
 0x2de   :  { %299 = vst [vmem:[%s552_s3 + $0x30] sm:$0xf] %v283_v32  ;;  %300 = vst [vmem:[%s552_s3 + $0x38] sm:$0xf] %v284_v33  ;;  %v272_v5 = vpop.permute.xlu1 %271 }
 0x2df   :  { %293 = vst [vmem:[%s552_s3] sm:$0xff] %v277_v34  ;;  %294 = vst [vmem:[%s552_s3 + $0x8] sm:$0xff] %v278_v35  ;;  %v285_v6 = vmul.f32 %v272_v5, %v374_v0  ;;  %v286_v7 = vmul.f32 %v272_v5, %v379_v1  ;;  %v287_v8 = vmul.f32 %v272_v5, %v384_v2 }
 0x2e0   :  { %295 = vst [vmem:[%s552_s3 + $0x10] sm:$0xff] %v279_v36  ;;  %296 = vst [vmem:[%s552_s3 + $0x18] sm:$0xff] %v280_v37  ;;  %v288_v19 = vmul.f32 %v272_v5, %v389_v3 }
 0x2e1   :  { %301 = vst [vmem:[%s552_s3 + $0x40] sm:$0xff] %v285_v6  ;;  %302 = vst [vmem:[%s552_s3 + $0x48] sm:$0xff] %v286_v7 }
 0x2e2   :  { %303 = vst [vmem:[%s552_s3 + $0x50] sm:$0xff] %v287_v8  ;;  %304 = vst [vmem:[%s552_s3 + $0x58] sm:$0xff] %v288_v19  ;;  %v276_v0 = vpop.permute.xlu1 %275 }
 0x2e3   :  { %v289_v1 = vmul.f32 %v276_v0, %v418_v10  ;;  %v290_v2 = vmul.f32 %v276_v0, %v424_v12  ;;  %v291_v3 = vmul.f32 %v276_v0, %v429_v13  ;;  %v292_v22 = vmul.f32 %v276_v0, %v434_v14 }
 0x2e5   :  { %305 = vst [vmem:[%s552_s3 + $0x60] sm:$0xf] %v289_v1  ;;  %306 = vst [vmem:[%s552_s3 + $0x68] sm:$0xf] %v290_v2 }
 0x2e6   :  { %307 = vst [vmem:[%s552_s3 + $0x70] sm:$0xf] %v291_v3  ;;  %308 = vst [vmem:[%s552_s3 + $0x78] sm:$0xf] %v292_v22 }

</bundles_post_ra>
